<compile_context>
chip_gen: v7x
topology: tpu7x:2x2x1
jax: 0.10.0
libtpu: 0.0.40
codegen_flags: <defaults>
</compile_context>

<pallas_src>
import math
import jax
import jax.numpy as jnp
from jax.experimental import pallas as pl
from jax.experimental.pallas import tpu as pltpu

# --- "config" (small, consistent with the module) -------------------------
HIDDEN = 32
N_HEADS = 4
HEAD_DIM = HIDDEN // N_HEADS
INTERMEDIATE = 64
SEQ = 8
BATCH = 2
RMS_EPS = 1e-6
ROPE_BASE = 10000.0
NEG_MIN = float(jnp.finfo(jnp.float32).min)
SCALE = 1.0 / math.sqrt(HEAD_DIM)


def _rms_norm(x, w_row):
    # x: (N, H) f32, w_row: (1, H) f32
    var = jnp.mean(x * x, axis=-1, keepdims=True)
    return x * jax.lax.rsqrt(var + RMS_EPS) * w_row


# --- the fused decoder-layer kernel ----------------------------------------
def decoder_layer_kernel(
    x_ref, mask_ref, cos_ref, sin_ref, hmask_ref, in_mask_ref, out_mask_ref,
    ln1_ref, ln2_ref, wqkv_ref, wo_ref, wgu_ref, wdown_ref, out_ref,
):
    x = x_ref[...]                       # (BS, H) f32
    cos = cos_ref[...]                   # (BS, H) f32
    sin = sin_ref[...]                   # (BS, H) f32
    mask = mask_ref[...]                 # (BS, BS) additive (0 / finfo.min)

    # ---- input_layernorm (LlamaRMSNorm) ----
    h1 = _rms_norm(x, ln1_ref[...])
    h1b = h1.astype(jnp.bfloat16)

    # ---- fused [q | rot(q) | k | rot(k) | v] projection: one MXU push ----
    qkv = jnp.dot(h1b, wqkv_ref[...], preferred_element_type=jnp.float32)  # (BS, 5H)
    # RoPE at full (BS, H) width (rotate_half is folded into the weight columns).
    q = qkv[:, 0 * HIDDEN:1 * HIDDEN] * cos + qkv[:, 1 * HIDDEN:2 * HIDDEN] * sin
    k = qkv[:, 2 * HIDDEN:3 * HIDDEN] * cos + qkv[:, 3 * HIDDEN:4 * HIDDEN] * sin
    v = qkv[:, 4 * HIDDEN:5 * HIDDEN]

    # heads on the leading dim -> single batched contraction for all heads/batches
    def heads(t):
        return jnp.stack(
            [t[:, h * HEAD_DIM:(h + 1) * HEAD_DIM] for h in range(N_HEADS)], axis=0)

    qh = heads(q).astype(jnp.bfloat16)   # (nH, BS, Dh)
    kh = heads(k).astype(jnp.bfloat16)
    vh = heads(v).astype(jnp.bfloat16)

    scores = jnp.einsum("hqd,hkd->hqk", qh, kh,
                        preferred_element_type=jnp.float32) * SCALE
    scores = scores + mask               # cross-batch entries saturate at ~finfo.min
    scores = jnp.maximum(scores, NEG_MIN)        # torch.max(attn, finfo.min)
    m = jnp.max(scores, axis=-1, keepdims=True)
    p = jnp.exp(scores - m)
    denom = jnp.sum(p, axis=-1, keepdims=True)
    probs = (p * pl.reciprocal(denom, approx=True)).astype(jnp.bfloat16)
    # TODO(synk): nn.Dropout(p=0.003) on attn_weights treated as identity (eval mode).
    ctx = jnp.einsum("hqk,hkd->hqd", probs, vh,
                     preferred_element_type=jnp.float32)    # (nH, BS, Dh)

    attn = jnp.concatenate([ctx[h] for h in range(N_HEADS)], axis=-1)   # (BS, H)
    # head_mask folded into one full-width multiply: (probs*m)@v == (probs@v)*m.
    attn = attn * hmask_ref[...]
    attn = jnp.dot(attn.astype(jnp.bfloat16), wo_ref[...],
                   preferred_element_type=jnp.float32)

    hidden = x + attn                                        # residual 1

    # ---- post_attention_layernorm + SoftMask MLP (fused gate|up matmul) ----
    h2 = _rms_norm(hidden, ln2_ref[...])
    gu = jnp.dot(h2.astype(jnp.bfloat16), wgu_ref[...],
                 preferred_element_type=jnp.float32)         # (BS, 128) lane-dense
    gate = gu[:, :INTERMEDIATE]
    up = gu[:, INTERMEDIATE:] * in_mask_ref[...]
    inter = gate * jax.nn.sigmoid(gate) * up                 # silu(gate) * (up*mask)
    down = jnp.dot(inter.astype(jnp.bfloat16), wdown_ref[...],
                   preferred_element_type=jnp.float32) * out_mask_ref[...]
    # TODO(synk): nn.Dropout(p=0.003) on the MLP output treated as identity (eval mode).

    out_ref[...] = (hidden + down).astype(out_ref.dtype)     # residual 2


# --- wrapper ----------------------------------------------------------------
def decoder_layer(x, attn_mask, cos, sin, head_mask, in_mask, out_mask, params):
    B, S, H = x.shape
    BS = B * S

    # rotate_half as a constant (H, H) signed block-diag permutation, folded into weights
    half = HEAD_DIM // 2
    rot = jnp.block([
        [jnp.zeros((half, half), jnp.float32), jnp.eye(half, dtype=jnp.float32)],
        [-jnp.eye(half, dtype=jnp.float32), jnp.zeros((half, half), jnp.float32)],
    ])
    P = jnp.kron(jnp.eye(N_HEADS, dtype=jnp.float32), rot)                 # (H, H)

    wq, wk, wv = params["wq"], params["wk"], params["wv"]
    w_qkv = jnp.concatenate([wq, wq @ P, wk, wk @ P, wv], axis=1).astype(jnp.bfloat16)
    w_gu = jnp.concatenate([params["w_gate"], params["w_up"]], axis=1).astype(jnp.bfloat16)
    wo = params["wo"].astype(jnp.bfloat16)
    w_down = params["w_down"].astype(jnp.bfloat16)

    # cos/sin tiled to full (B*S, H) width; per-head scalar mask expanded to (1, H)
    cos_f = jnp.tile(jnp.tile(cos, (1, N_HEADS)), (B, 1))
    sin_f = jnp.tile(jnp.tile(sin, (1, N_HEADS)), (B, 1))
    hmask_f = jnp.repeat(head_mask, HEAD_DIM)[None, :]

    # Fold batch into rows: block-diagonal (BS, BS) additive mask; cross-batch
    # blocks get finfo.min so they contribute exactly 0 after softmax.
    rows = jnp.arange(BS)
    rb, rs = rows // S, rows % S
    am = attn_mask[:, 0]                                     # (B, S, S)
    within = am[rb[:, None], rs[:, None], rs[None, :]]       # (BS, BS)
    mask_f = jnp.where(rb[:, None] == rb[None, :], within, NEG_MIN).astype(jnp.float32)

    x2 = x.reshape(BS, H)
    operands = (x2, mask_f, cos_f, sin_f, hmask_f, in_mask, out_mask,
                params["ln1"], params["ln2"], w_qkv, wo, w_gu, w_down)

    def full_spec(shape):
        return pl.BlockSpec(shape, lambda i: (0,) * len(shape))

    out = pl.pallas_call(
        decoder_layer_kernel,
        out_shape=jax.ShapeDtypeStruct((BS, H), x.dtype),
        grid_spec=pltpu.PrefetchScalarGridSpec(
            num_scalar_prefetch=0,
            grid=(1,),                        # whole batch in one invocation
            in_specs=[full_spec(a.shape) for a in operands],
            out_specs=full_spec((BS, H)),
        ),
        compiler_params=pltpu.CompilerParams(dimension_semantics=("arbitrary",)),
    )(*operands)
    return out.reshape(B, S, H)


# --- pure-JAX f32 reference (mirrors the PyTorch forward) --------------------
def reference(x, attn_mask, cos, sin, head_mask, in_mask, out_mask, p):
    def rms(v, w):
        var = jnp.mean(v * v, -1, keepdims=True)
        return v * jax.lax.rsqrt(var + RMS_EPS) * w

    h1 = rms(x, p["ln1"][0])
    q = h1 @ p["wq"]
    k = h1 @ p["wk"]
    v = h1 @ p["wv"]

    def split(t):
        return t.reshape(BATCH, SEQ, N_HEADS, HEAD_DIM).transpose(0, 2, 1, 3)

    q, k, v = split(q), split(k), split(v)

    def rot(t):
        half = HEAD_DIM // 2
        return jnp.concatenate([-t[..., half:], t[..., :half]], -1)

    q = q * cos + rot(q) * sin
    k = k * cos + rot(k) * sin
    scores = jnp.einsum("bhqd,bhkd->bhqk", q, k) / math.sqrt(HEAD_DIM)
    scores = scores + attn_mask
    scores = jnp.maximum(scores, NEG_MIN)
    probs = jax.nn.softmax(scores, -1)
    probs = probs * head_mask[None, :, None, None]
    attn = jnp.einsum("bhqk,bhkd->bhqd", probs, v)
    attn = attn.transpose(0, 2, 1, 3).reshape(BATCH, SEQ, HIDDEN) @ p["wo"]
    hidden = x + attn

    h2 = rms(hidden, p["ln2"][0])
    up = (h2 @ p["w_up"]) * in_mask[0]
    gate = h2 @ p["w_gate"]
    inter = jax.nn.silu(gate) * up
    down = (inter @ p["w_down"]) * out_mask[0]
    return hidden + down


# --- deterministic setup + run ----------------------------------------------
if __name__ == "__main__":
    key = jax.random.PRNGKey(0)
    keys = jax.random.split(key, 12)

    def w(k, shape):
        return (0.02 * jax.random.normal(k, shape)).astype(jnp.float32)

    params = {
        "wq": w(keys[0], (HIDDEN, HIDDEN)),
        "wk": w(keys[1], (HIDDEN, HIDDEN)),
        "wv": w(keys[2], (HIDDEN, HIDDEN)),
        "wo": w(keys[3], (HIDDEN, HIDDEN)),
        "w_gate": w(keys[4], (HIDDEN, INTERMEDIATE)),
        "w_up": w(keys[5], (HIDDEN, INTERMEDIATE)),
        "w_down": w(keys[6], (INTERMEDIATE, HIDDEN)),
        "ln1": jnp.ones((1, HIDDEN), jnp.float32),
        "ln2": jnp.ones((1, HIDDEN), jnp.float32),
    }

    # inputs
    x = jax.random.normal(keys[7], (BATCH, SEQ, HIDDEN), jnp.float32)

    # causal additive attention mask (B, 1, S, S): 0 allowed / finfo.min disallowed
    row = jnp.arange(SEQ)[:, None]
    col = jnp.arange(SEQ)[None, :]
    causal = jnp.where(col <= row, 0.0, NEG_MIN).astype(jnp.float32)
    attn_mask = jnp.broadcast_to(causal, (BATCH, 1, SEQ, SEQ))

    # rotary cos/sin for position_ids = arange(SEQ)
    inv_freq = 1.0 / (ROPE_BASE ** (jnp.arange(0, HEAD_DIM, 2, dtype=jnp.float32) / HEAD_DIM))
    t = jnp.arange(SEQ, dtype=jnp.float32)
    freqs = jnp.outer(t, inv_freq)                      # (S, Dh/2)
    emb = jnp.concatenate([freqs, freqs], axis=-1)      # (S, Dh)
    cos = jnp.cos(emb).astype(jnp.float32)
    sin = jnp.sin(emb).astype(jnp.float32)

    # soft masks
    head_mask = (0.5 + 0.5 * jax.random.uniform(keys[8], (N_HEADS,))).astype(jnp.float32)
    in_mask = (0.5 + 0.5 * jax.random.uniform(keys[9], (1, INTERMEDIATE))).astype(jnp.float32)
    out_mask = (0.5 + 0.5 * jax.random.uniform(keys[10], (1, HIDDEN))).astype(jnp.float32)

    out = decoder_layer(x, attn_mask, cos, sin, head_mask, in_mask, out_mask, params)
    out = jax.block_until_ready(out)

    ref = jax.block_until_ready(
        reference(x, attn_mask, cos, sin, head_mask, in_mask, out_mask, params)
    )
    assert out.shape == (BATCH, SEQ, HIDDEN)
    # tolerance covers bf16 MXU operands (f32 accumulation); elementwise path is f32
    assert jnp.allclose(out, ref, atol=5e-3, rtol=5e-3), "mismatch vs reference"

    print("KERNEL_OK")
</pallas_src>

<mosaic_0001>
module attributes {stable_mosaic.version = 11 : i64} {
  func.func @decoder_layer_kernel(%arg0: i32, %arg1: memref<16x32xf32, #tpu.memory_space<vmem>>, %arg2: memref<16x16xf32, #tpu.memory_space<vmem>>, %arg3: memref<16x32xf32, #tpu.memory_space<vmem>>, %arg4: memref<16x32xf32, #tpu.memory_space<vmem>>, %arg5: memref<1x32xf32, #tpu.memory_space<vmem>>, %arg6: memref<1x64xf32, #tpu.memory_space<vmem>>, %arg7: memref<1x32xf32, #tpu.memory_space<vmem>>, %arg8: memref<1x32xf32, #tpu.memory_space<vmem>>, %arg9: memref<1x32xf32, #tpu.memory_space<vmem>>, %arg10: memref<32x160xbf16, #tpu.memory_space<vmem>>, %arg11: memref<32x32xbf16, #tpu.memory_space<vmem>>, %arg12: memref<32x128xbf16, #tpu.memory_space<vmem>>, %arg13: memref<64x32xbf16, #tpu.memory_space<vmem>>, %arg14: memref<16x32xf32, #tpu.memory_space<vmem>>) attributes {dimension_semantics = [#tpu.dimension_semantics<arbitrary>], iteration_bounds = array<i64: 1>, scalar_prefetch = 0 : i64, scratch_operands = 0 : i64, tpu.core_type = #tpu.core_type<tc>, window_params = [{pipeline_mode = #tpu.pipeline_mode<synchronous>, transform_indices = @transform_0, window_bounds = array<i64: 16, 32>}, {pipeline_mode = #tpu.pipeline_mode<synchronous>, transform_indices = @transform_1, window_bounds = array<i64: 16, 16>}, {pipeline_mode = #tpu.pipeline_mode<synchronous>, transform_indices = @transform_2, window_bounds = array<i64: 16, 32>}, {pipeline_mode = #tpu.pipeline_mode<synchronous>, transform_indices = @transform_3, window_bounds = array<i64: 16, 32>}, {pipeline_mode = #tpu.pipeline_mode<synchronous>, transform_indices = @transform_4, window_bounds = array<i64: 1, 32>}, {pipeline_mode = #tpu.pipeline_mode<synchronous>, transform_indices = @transform_5, window_bounds = array<i64: 1, 64>}, {pipeline_mode = #tpu.pipeline_mode<synchronous>, transform_indices = @transform_6, window_bounds = array<i64: 1, 32>}, {pipeline_mode = #tpu.pipeline_mode<synchronous>, transform_indices = @transform_7, window_bounds = array<i64: 1, 32>}, {pipeline_mode = #tpu.pipeline_mode<synchronous>, transform_indices = @transform_8, window_bounds = array<i64: 1, 32>}, {pipeline_mode = #tpu.pipeline_mode<synchronous>, transform_indices = @transform_9, window_bounds = array<i64: 32, 160>}, {pipeline_mode = #tpu.pipeline_mode<synchronous>, transform_indices = @transform_10, window_bounds = array<i64: 32, 32>}, {pipeline_mode = #tpu.pipeline_mode<synchronous>, transform_indices = @transform_11, window_bounds = array<i64: 32, 128>}, {pipeline_mode = #tpu.pipeline_mode<synchronous>, transform_indices = @transform_12, window_bounds = array<i64: 64, 32>}, {pipeline_mode = #tpu.pipeline_mode<synchronous>, transform_indices = @transform_13, window_bounds = array<i64: 16, 32>}]} {
    %c0 = arith.constant 0 : index
    %c0_0 = arith.constant 0 : index
    %0 = vector.load %arg1[%c0, %c0_0] : memref<16x32xf32, #tpu.memory_space<vmem>>, vector<16x32xf32>
    %c0_1 = arith.constant 0 : index
    %c0_2 = arith.constant 0 : index
    %1 = vector.load %arg3[%c0_1, %c0_2] : memref<16x32xf32, #tpu.memory_space<vmem>>, vector<16x32xf32>
    %c0_3 = arith.constant 0 : index
    %c0_4 = arith.constant 0 : index
    %2 = vector.load %arg4[%c0_3, %c0_4] : memref<16x32xf32, #tpu.memory_space<vmem>>, vector<16x32xf32>
    %c0_5 = arith.constant 0 : index
    %c0_6 = arith.constant 0 : index
    %3 = vector.load %arg2[%c0_5, %c0_6] : memref<16x16xf32, #tpu.memory_space<vmem>>, vector<16x16xf32>
    %c0_7 = arith.constant 0 : index
    %c0_8 = arith.constant 0 : index
    %4 = vector.load %arg8[%c0_7, %c0_8] : memref<1x32xf32, #tpu.memory_space<vmem>>, vector<1x32xf32>
    %5 = arith.mulf %0, %0 : vector<16x32xf32>
    %cst = arith.constant dense<0.000000e+00> : vector<16xf32>
    %6 = vector.multi_reduction <add>, %5, %cst [1] : vector<16x32xf32> to vector<16xf32>
    %7 = vector.shape_cast %6 : vector<16xf32> to vector<16x1xf32>
    %cst_9 = arith.constant 3.200000e+01 : f32
    %8 = vector.broadcast %cst_9 : f32 to vector<16x1xf32>
    %9 = arith.divf %7, %8 : vector<16x1xf32>
    %cst_10 = arith.constant 9.99999997E-7 : f32
    %10 = vector.broadcast %cst_10 : f32 to vector<16x1xf32>
    %11 = arith.addf %9, %10 : vector<16x1xf32>
    %12 = math.rsqrt %11 : vector<16x1xf32>
    %13 = vector.broadcast %12 : vector<16x1xf32> to vector<16x32xf32>
    %14 = arith.mulf %0, %13 : vector<16x32xf32>
    %15 = vector.broadcast %4 : vector<1x32xf32> to vector<16x32xf32>
    %16 = arith.mulf %14, %15 : vector<16x32xf32>
    %17 = arith.truncf %16 : vector<16x32xf32> to vector<16x32xbf16>
    %c0_11 = arith.constant 0 : index
    %c0_12 = arith.constant 0 : index
    %18 = vector.load %arg10[%c0_11, %c0_12] : memref<32x160xbf16, #tpu.memory_space<vmem>>, vector<32x160xbf16>
    %cst_13 = arith.constant dense<0.000000e+00> : vector<16x160xf32>
    %19 = tpu.matmul %17, %18, %cst_13 {dimension_numbers = #tpu.dot_dimension_numbers<[1], [0], [0], [1], [0, 0, 1, 1], [], []>} : vector<16x32xbf16>, vector<32x160xbf16>, vector<16x160xf32> -> vector<16x160xf32>
    %20 = vector.extract_strided_slice %19 {offsets = [0, 0], sizes = [16, 32], strides = [1, 1]} : vector<16x160xf32> to vector<16x32xf32>
    %21 = arith.mulf %20, %1 : vector<16x32xf32>
    %22 = vector.extract_strided_slice %19 {offsets = [0, 32], sizes = [16, 32], strides = [1, 1]} : vector<16x160xf32> to vector<16x32xf32>
    %23 = arith.mulf %22, %2 : vector<16x32xf32>
    %24 = arith.addf %21, %23 : vector<16x32xf32>
    %25 = vector.extract_strided_slice %19 {offsets = [0, 64], sizes = [16, 32], strides = [1, 1]} : vector<16x160xf32> to vector<16x32xf32>
    %26 = arith.mulf %25, %1 : vector<16x32xf32>
    %27 = vector.extract_strided_slice %19 {offsets = [0, 96], sizes = [16, 32], strides = [1, 1]} : vector<16x160xf32> to vector<16x32xf32>
    %28 = arith.mulf %27, %2 : vector<16x32xf32>
    %29 = arith.addf %26, %28 : vector<16x32xf32>
    %30 = vector.extract_strided_slice %19 {offsets = [0, 128], sizes = [16, 32], strides = [1, 1]} : vector<16x160xf32> to vector<16x32xf32>
    %31 = vector.extract_strided_slice %24 {offsets = [0, 0], sizes = [16, 8], strides = [1, 1]} : vector<16x32xf32> to vector<16x8xf32>
    %32 = vector.extract_strided_slice %24 {offsets = [0, 8], sizes = [16, 8], strides = [1, 1]} : vector<16x32xf32> to vector<16x8xf32>
    %33 = vector.extract_strided_slice %24 {offsets = [0, 16], sizes = [16, 8], strides = [1, 1]} : vector<16x32xf32> to vector<16x8xf32>
    %34 = vector.extract_strided_slice %24 {offsets = [0, 24], sizes = [16, 8], strides = [1, 1]} : vector<16x32xf32> to vector<16x8xf32>
    %35 = vector.shape_cast %31 : vector<16x8xf32> to vector<1x16x8xf32>
    %36 = vector.shape_cast %32 : vector<16x8xf32> to vector<1x16x8xf32>
    %37 = vector.shape_cast %33 : vector<16x8xf32> to vector<1x16x8xf32>
    %38 = vector.shape_cast %34 : vector<16x8xf32> to vector<1x16x8xf32>
    %39 = tpu.concatenate %35, %36, %37, %38 in 0 : vector<1x16x8xf32>, vector<1x16x8xf32>, vector<1x16x8xf32>, vector<1x16x8xf32> -> vector<4x16x8xf32>
    %40 = arith.truncf %39 : vector<4x16x8xf32> to vector<4x16x8xbf16>
    %41 = vector.extract_strided_slice %29 {offsets = [0, 0], sizes = [16, 8], strides = [1, 1]} : vector<16x32xf32> to vector<16x8xf32>
    %42 = vector.extract_strided_slice %29 {offsets = [0, 8], sizes = [16, 8], strides = [1, 1]} : vector<16x32xf32> to vector<16x8xf32>
    %43 = vector.extract_strided_slice %29 {offsets = [0, 16], sizes = [16, 8], strides = [1, 1]} : vector<16x32xf32> to vector<16x8xf32>
    %44 = vector.extract_strided_slice %29 {offsets = [0, 24], sizes = [16, 8], strides = [1, 1]} : vector<16x32xf32> to vector<16x8xf32>
    %45 = vector.shape_cast %41 : vector<16x8xf32> to vector<1x16x8xf32>
    %46 = vector.shape_cast %42 : vector<16x8xf32> to vector<1x16x8xf32>
    %47 = vector.shape_cast %43 : vector<16x8xf32> to vector<1x16x8xf32>
    %48 = vector.shape_cast %44 : vector<16x8xf32> to vector<1x16x8xf32>
    %49 = tpu.concatenate %45, %46, %47, %48 in 0 : vector<1x16x8xf32>, vector<1x16x8xf32>, vector<1x16x8xf32>, vector<1x16x8xf32> -> vector<4x16x8xf32>
    %50 = arith.truncf %49 : vector<4x16x8xf32> to vector<4x16x8xbf16>
    %51 = vector.extract_strided_slice %30 {offsets = [0, 0], sizes = [16, 8], strides = [1, 1]} : vector<16x32xf32> to vector<16x8xf32>
    %52 = vector.extract_strided_slice %30 {offsets = [0, 8], sizes = [16, 8], strides = [1, 1]} : vector<16x32xf32> to vector<16x8xf32>
    %53 = vector.extract_strided_slice %30 {offsets = [0, 16], sizes = [16, 8], strides = [1, 1]} : vector<16x32xf32> to vector<16x8xf32>
    %54 = vector.extract_strided_slice %30 {offsets = [0, 24], sizes = [16, 8], strides = [1, 1]} : vector<16x32xf32> to vector<16x8xf32>
    %55 = vector.shape_cast %51 : vector<16x8xf32> to vector<1x16x8xf32>
    %56 = vector.shape_cast %52 : vector<16x8xf32> to vector<1x16x8xf32>
    %57 = vector.shape_cast %53 : vector<16x8xf32> to vector<1x16x8xf32>
    %58 = vector.shape_cast %54 : vector<16x8xf32> to vector<1x16x8xf32>
    %59 = tpu.concatenate %55, %56, %57, %58 in 0 : vector<1x16x8xf32>, vector<1x16x8xf32>, vector<1x16x8xf32>, vector<1x16x8xf32> -> vector<4x16x8xf32>
    %60 = arith.truncf %59 : vector<4x16x8xf32> to vector<4x16x8xbf16>
    "tpu.trace_start"() <{level = 10 : i32, message = "hqd,hkd->hqk"}> : () -> ()
    %cst_14 = arith.constant dense<0.000000e+00> : vector<4x16x16xf32>
    %61 = tpu.matmul %40, %50, %cst_14 {dimension_numbers = #tpu.dot_dimension_numbers<[2], [2], [1], [1], [0, 0, 0, 1, 1, 1], [0], [0]>} : vector<4x16x8xbf16>, vector<4x16x8xbf16>, vector<4x16x16xf32> -> vector<4x16x16xf32>
    "tpu.trace_stop"() : () -> ()
    %cst_15 = arith.constant 0.353553385 : f32
    %62 = vector.broadcast %cst_15 : f32 to vector<4x16x16xf32>
    %63 = arith.mulf %61, %62 : vector<4x16x16xf32>
    %64 = vector.shape_cast %3 : vector<16x16xf32> to vector<1x16x16xf32>
    %65 = vector.broadcast %64 : vector<1x16x16xf32> to vector<4x16x16xf32>
    %66 = arith.addf %63, %65 : vector<4x16x16xf32>
    %cst_16 = arith.constant -3.40282347E+38 : f32
    %67 = vector.broadcast %cst_16 : f32 to vector<4x16x16xf32>
    %68 = arith.maximumf %66, %67 : vector<4x16x16xf32>
    %cst_17 = arith.constant dense<0xFF800000> : vector<4x16xf32>
    %69 = vector.multi_reduction <maximumf>, %68, %cst_17 [2] : vector<4x16x16xf32> to vector<4x16xf32>
    %70 = vector.shape_cast %69 : vector<4x16xf32> to vector<4x16x1xf32>
    %71 = vector.broadcast %70 : vector<4x16x1xf32> to vector<4x16x16xf32>
    %72 = arith.subf %68, %71 : vector<4x16x16xf32>
    %73 = math.exp %72 : vector<4x16x16xf32>
    %cst_18 = arith.constant dense<0.000000e+00> : vector<4x16xf32>
    %74 = vector.multi_reduction <add>, %73, %cst_18 [2] : vector<4x16x16xf32> to vector<4x16xf32>
    %75 = vector.shape_cast %74 : vector<4x16xf32> to vector<4x16x1xf32>
    %76 = tpu.reciprocal %75 {approx = true} : vector<4x16x1xf32> -> vector<4x16x1xf32>
    %77 = vector.broadcast %76 : vector<4x16x1xf32> to vector<4x16x16xf32>
    %78 = arith.mulf %73, %77 : vector<4x16x16xf32>
    %79 = arith.truncf %78 : vector<4x16x16xf32> to vector<4x16x16xbf16>
    "tpu.trace_start"() <{level = 10 : i32, message = "hqk,hkd->hqd"}> : () -> ()
    %cst_19 = arith.constant dense<0.000000e+00> : vector<4x16x8xf32>
    %80 = tpu.matmul %79, %60, %cst_19 {dimension_numbers = #tpu.dot_dimension_numbers<[2], [1], [1], [2], [0, 0, 0, 1, 1, 2], [0], [0]>} : vector<4x16x16xbf16>, vector<4x16x8xbf16>, vector<4x16x8xf32> -> vector<4x16x8xf32>
    "tpu.trace_stop"() : () -> ()
    %81 = vector.extract_strided_slice %80 {offsets = [0, 0, 0], sizes = [1, 16, 8], strides = [1, 1, 1]} : vector<4x16x8xf32> to vector<1x16x8xf32>
    %82 = vector.shape_cast %81 : vector<1x16x8xf32> to vector<16x8xf32>
    %83 = vector.extract_strided_slice %80 {offsets = [1, 0, 0], sizes = [1, 16, 8], strides = [1, 1, 1]} : vector<4x16x8xf32> to vector<1x16x8xf32>
    %84 = vector.shape_cast %83 : vector<1x16x8xf32> to vector<16x8xf32>
    %85 = vector.extract_strided_slice %80 {offsets = [2, 0, 0], sizes = [1, 16, 8], strides = [1, 1, 1]} : vector<4x16x8xf32> to vector<1x16x8xf32>
    %86 = vector.shape_cast %85 : vector<1x16x8xf32> to vector<16x8xf32>
    %87 = vector.extract_strided_slice %80 {offsets = [3, 0, 0], sizes = [1, 16, 8], strides = [1, 1, 1]} : vector<4x16x8xf32> to vector<1x16x8xf32>
    %88 = vector.shape_cast %87 : vector<1x16x8xf32> to vector<16x8xf32>
    %89 = tpu.concatenate %82, %84, %86, %88 in 1 : vector<16x8xf32>, vector<16x8xf32>, vector<16x8xf32>, vector<16x8xf32> -> vector<16x32xf32>
    %c0_20 = arith.constant 0 : index
    %c0_21 = arith.constant 0 : index
    %90 = vector.load %arg5[%c0_20, %c0_21] : memref<1x32xf32, #tpu.memory_space<vmem>>, vector<1x32xf32>
    %91 = vector.broadcast %90 : vector<1x32xf32> to vector<16x32xf32>
    %92 = arith.mulf %89, %91 : vector<16x32xf32>
    %93 = arith.truncf %92 : vector<16x32xf32> to vector<16x32xbf16>
    %c0_22 = arith.constant 0 : index
    %c0_23 = arith.constant 0 : index
    %94 = vector.load %arg11[%c0_22, %c0_23] : memref<32x32xbf16, #tpu.memory_space<vmem>>, vector<32x32xbf16>
    %cst_24 = arith.constant dense<0.000000e+00> : vector<16x32xf32>
    %95 = tpu.matmul %93, %94, %cst_24 {dimension_numbers = #tpu.dot_dimension_numbers<[1], [0], [0], [1], [0, 0, 1, 1], [], []>} : vector<16x32xbf16>, vector<32x32xbf16>, vector<16x32xf32> -> vector<16x32xf32>
    %96 = arith.addf %0, %95 : vector<16x32xf32>
    %c0_25 = arith.constant 0 : index
    %c0_26 = arith.constant 0 : index
    %97 = vector.load %arg9[%c0_25, %c0_26] : memref<1x32xf32, #tpu.memory_space<vmem>>, vector<1x32xf32>
    %98 = arith.mulf %96, %96 : vector<16x32xf32>
    %cst_27 = arith.constant dense<0.000000e+00> : vector<16xf32>
    %99 = vector.multi_reduction <add>, %98, %cst_27 [1] : vector<16x32xf32> to vector<16xf32>
    %100 = vector.shape_cast %99 : vector<16xf32> to vector<16x1xf32>
    %cst_28 = arith.constant 3.200000e+01 : f32
    %101 = vector.broadcast %cst_28 : f32 to vector<16x1xf32>
    %102 = arith.divf %100, %101 : vector<16x1xf32>
    %cst_29 = arith.constant 9.99999997E-7 : f32
    %103 = vector.broadcast %cst_29 : f32 to vector<16x1xf32>
    %104 = arith.addf %102, %103 : vector<16x1xf32>
    %105 = math.rsqrt %104 : vector<16x1xf32>
    %106 = vector.broadcast %105 : vector<16x1xf32> to vector<16x32xf32>
    %107 = arith.mulf %96, %106 : vector<16x32xf32>
    %108 = vector.broadcast %97 : vector<1x32xf32> to vector<16x32xf32>
    %109 = arith.mulf %107, %108 : vector<16x32xf32>
    %110 = arith.truncf %109 : vector<16x32xf32> to vector<16x32xbf16>
    %c0_30 = arith.constant 0 : index
    %c0_31 = arith.constant 0 : index
    %111 = vector.load %arg12[%c0_30, %c0_31] : memref<32x128xbf16, #tpu.memory_space<vmem>>, vector<32x128xbf16>
    %cst_32 = arith.constant dense<0.000000e+00> : vector<16x128xf32>
    %112 = tpu.matmul %110, %111, %cst_32 {dimension_numbers = #tpu.dot_dimension_numbers<[1], [0], [0], [1], [0, 0, 1, 1], [], []>} : vector<16x32xbf16>, vector<32x128xbf16>, vector<16x128xf32> -> vector<16x128xf32>
    %113 = vector.extract_strided_slice %112 {offsets = [0, 0], sizes = [16, 64], strides = [1, 1]} : vector<16x128xf32> to vector<16x64xf32>
    %114 = vector.extract_strided_slice %112 {offsets = [0, 64], sizes = [16, 64], strides = [1, 1]} : vector<16x128xf32> to vector<16x64xf32>
    %c0_33 = arith.constant 0 : index
    %c0_34 = arith.constant 0 : index
    %115 = vector.load %arg6[%c0_33, %c0_34] : memref<1x64xf32, #tpu.memory_space<vmem>>, vector<1x64xf32>
    %116 = vector.broadcast %115 : vector<1x64xf32> to vector<16x64xf32>
    %117 = arith.mulf %114, %116 : vector<16x64xf32>
    %118 = arith.negf %113 : vector<16x64xf32>
    %119 = math.exp %118 : vector<16x64xf32>
    %cst_35 = arith.constant 1.000000e+00 : f32
    %120 = vector.broadcast %cst_35 : f32 to vector<16x64xf32>
    %121 = arith.addf %120, %119 : vector<16x64xf32>
    %122 = arith.divf %120, %121 : vector<16x64xf32>
    %123 = arith.mulf %113, %122 : vector<16x64xf32>
    %124 = arith.mulf %123, %117 : vector<16x64xf32>
    %125 = arith.truncf %124 : vector<16x64xf32> to vector<16x64xbf16>
    %c0_36 = arith.constant 0 : index
    %c0_37 = arith.constant 0 : index
    %126 = vector.load %arg13[%c0_36, %c0_37] : memref<64x32xbf16, #tpu.memory_space<vmem>>, vector<64x32xbf16>
    %cst_38 = arith.constant dense<0.000000e+00> : vector<16x32xf32>
    %127 = tpu.matmul %125, %126, %cst_38 {dimension_numbers = #tpu.dot_dimension_numbers<[1], [0], [0], [1], [0, 0, 1, 1], [], []>} : vector<16x64xbf16>, vector<64x32xbf16>, vector<16x32xf32> -> vector<16x32xf32>
    %c0_39 = arith.constant 0 : index
    %c0_40 = arith.constant 0 : index
    %128 = vector.load %arg7[%c0_39, %c0_40] : memref<1x32xf32, #tpu.memory_space<vmem>>, vector<1x32xf32>
    %129 = vector.broadcast %128 : vector<1x32xf32> to vector<16x32xf32>
    %130 = arith.mulf %127, %129 : vector<16x32xf32>
    %131 = arith.addf %96, %130 : vector<16x32xf32>
    %c0_41 = arith.constant 0 : index
    %c0_42 = arith.constant 0 : index
    %132 = vector.load %arg14[%c0_41, %c0_42] : memref<16x32xf32, #tpu.memory_space<vmem>>, vector<16x32xf32>
    tpu.vector_store %arg14[%c0_41, %c0_42], %131 {strides = array<i32>} : memref<16x32xf32, #tpu.memory_space<vmem>>, vector<16x32xf32>,
    return
  }
  func.func @transform_0(%arg0: i32) -> (i32, i32) {
    %c0_i32 = arith.constant 0 : i32
    %c0_i32_0 = arith.constant 0 : i32
    %c0_i32_1 = arith.constant 0 : i32
    return %c0_i32, %c0_i32_0 : i32, i32
  }
  func.func @transform_1(%arg0: i32) -> (i32, i32) {
    %c0_i32 = arith.constant 0 : i32
    %c0_i32_0 = arith.constant 0 : i32
    %c0_i32_1 = arith.constant 0 : i32
    return %c0_i32, %c0_i32_0 : i32, i32
  }
  func.func @transform_2(%arg0: i32) -> (i32, i32) {
    %c0_i32 = arith.constant 0 : i32
    %c0_i32_0 = arith.constant 0 : i32
    %c0_i32_1 = arith.constant 0 : i32
    return %c0_i32, %c0_i32_0 : i32, i32
  }
  func.func @transform_3(%arg0: i32) -> (i32, i32) {
    %c0_i32 = arith.constant 0 : i32
    %c0_i32_0 = arith.constant 0 : i32
    %c0_i32_1 = arith.constant 0 : i32
    return %c0_i32, %c0_i32_0 : i32, i32
  }
  func.func @transform_4(%arg0: i32) -> (i32, i32) {
    %c0_i32 = arith.constant 0 : i32
    %c0_i32_0 = arith.constant 0 : i32
    %c0_i32_1 = arith.constant 0 : i32
    return %c0_i32, %c0_i32_0 : i32, i32
  }
  func.func @transform_5(%arg0: i32) -> (i32, i32) {
    %c0_i32 = arith.constant 0 : i32
    %c0_i32_0 = arith.constant 0 : i32
    %c0_i32_1 = arith.constant 0 : i32
    return %c0_i32, %c0_i32_0 : i32, i32
  }
  func.func @transform_6(%arg0: i32) -> (i32, i32) {
    %c0_i32 = arith.constant 0 : i32
    %c0_i32_0 = arith.constant 0 : i32
    %c0_i32_1 = arith.constant 0 : i32
    return %c0_i32, %c0_i32_0 : i32, i32
  }
  func.func @transform_7(%arg0: i32) -> (i32, i32) {
    %c0_i32 = arith.constant 0 : i32
    %c0_i32_0 = arith.constant 0 : i32
    %c0_i32_1 = arith.constant 0 : i32
    return %c0_i32, %c0_i32_0 : i32, i32
  }
  func.func @transform_8(%arg0: i32) -> (i32, i32) {
    %c0_i32 = arith.constant 0 : i32
    %c0_i32_0 = arith.constant 0 : i32
    %c0_i32_1 = arith.constant 0 : i32
    return %c0_i32, %c0_i32_0 : i32, i32
  }
  func.func @transform_9(%arg0: i32) -> (i32, i32) {
    %c0_i32 = arith.constant 0 : i32
    %c0_i32_0 = arith.constant 0 : i32
    %c0_i32_1 = arith.constant 0 : i32
    return %c0_i32, %c0_i32_0 : i32, i32
  }
  func.func @transform_10(%arg0: i32) -> (i32, i32) {
    %c0_i32 = arith.constant 0 : i32
    %c0_i32_0 = arith.constant 0 : i32
    %c0_i32_1 = arith.constant 0 : i32
    return %c0_i32, %c0_i32_0 : i32, i32
  }
  func.func @transform_11(%arg0: i32) -> (i32, i32) {
    %c0_i32 = arith.constant 0 : i32
    %c0_i32_0 = arith.constant 0 : i32
    %c0_i32_1 = arith.constant 0 : i32
    return %c0_i32, %c0_i32_0 : i32, i32
  }
  func.func @transform_12(%arg0: i32) -> (i32, i32) {
    %c0_i32 = arith.constant 0 : i32
    %c0_i32_0 = arith.constant 0 : i32
    %c0_i32_1 = arith.constant 0 : i32
    return %c0_i32, %c0_i32_0 : i32, i32
  }
  func.func @transform_13(%arg0: i32) -> (i32, i32) {
    %c0_i32 = arith.constant 0 : i32
    %c0_i32_0 = arith.constant 0 : i32
    %c0_i32_1 = arith.constant 0 : i32
    return %c0_i32, %c0_i32_0 : i32, i32
  }
}

</mosaic_0001>

<bundles_post_ra>
// kernel: tpu_custom_call.1
= control target key start
LH: loop header
LB: loop body
LE: loop exit
PB: predicated region body
PF: predicated region fallthrough
CT: control target
= control target key end

     0   :  { %18 = vsyncpa [#allocation3], 0  ;;  %s2060_s0 = inlined_call_operand.vmem [shape: f32[16,32], index: 0, kind: input, shape index: {}]   ;;  %s2061_s1 = inlined_call_operand.hbm [shape: f32[16,16], index: 1, kind: input, shape index: {}]   ;;  %s2062_s2 = inlined_call_operand.hbm [shape: f32[16,32], index: 2, kind: input, shape index: {}]   ;;  %s2063_s3 = inlined_call_operand.hbm [shape: f32[16,32], index: 3, kind: input, shape index: {}]   ;;  %s2064_s4 = inlined_call_operand.vmem [shape: f32[1,32], index: 4, kind: input, shape index: {}]   ;;  %s2065_s5 = inlined_call_operand.vmem [shape: f32[1,64], index: 5, kind: input, shape index: {}]   ;;  %s2066_s6 = inlined_call_operand.hbm [shape: f32[1,32], index: 6, kind: input, shape index: {}]   ;;  %s2067_s7 = inlined_call_operand.hbm [shape: f32[1,32], index: 7, kind: input, shape index: {}]   ;;  %s2068_s8 = inlined_call_operand.hbm [shape: f32[1,32], index: 8, kind: input, shape index: {}]   ;;  %s2069_s9 = inlined_call_operand.vmem [shape: bf16[32,160], index: 9, kind: input, shape index: {}]   ;;  %s2070_s10 = inlined_call_operand.vmem [shape: bf16[32,32], index: 10, kind: input, shape index: {}]   ;;  %s2071_s11 = inlined_call_operand.hbm [shape: bf16[32,128], index: 11, kind: input, shape index: {}]   ;;  %s2072_s12 = inlined_call_operand.vmem [shape: bf16[64,32], index: 12, kind: input, shape index: {}]   ;;  %s2073_s13 = inlined_call_operand.hbm [shape: f32[16,32], index: 13, kind: output, shape index: {}]  }
   0x1   :  { %19 = vsyncpa [#allocation6], 0 }
   0x2   :  { %20 = vsyncpa [#allocation9], 0 }
   0x3   :  { %21 = vsyncpa [#allocation12], 0 }
   0x4   :  { %22 = vsyncpa [#allocation4], 0  ;;  %s1641_s25 = smov [#allocation5]   ;;  %s1642_s27 = smov [#allocation8]  }
   0x5   :  { %s42_s26 = sshll.u32 %s1641_s25, 4  ;;  %s71_s28 = sshll.u32 %s1642_s27, 4  ;;  %s43_s26 = int_to_ptr.vmem [resolvable:$true] %s42_s26  ;;  %s1733_s28 = int_to_ptr.vmem [resolvable:$true] %s71_s28 }
   0x6   :  { %s1455_s14 = scalar_lea.hbm %s2062_s2, 256 }
   0x7   :  { %p1456_p0 = scmp.ne.s32.totalorder %s2062_s2, %s1455_s14  ;;  %p1459_p1 = scmp.lt.u32.totalorder %s1455_s14, %s2062_s2 }
   0x9   :  { %p1461_p2 = pnand %p1459_p1, %p1456_p0 }
   0xb   :  { %1464 = shalt.err (!%p1461_p2)
}
   0xc   :  { %s1465_s19 = scalar_lea.vmem %s43_s26, 256  ;;  %p1470_p4 = scmp.lt.s32.totalorder %s43_s26, %s43_s26 }
   0xd   :  { %p1466_p3 = scmp.ne.s32.totalorder %s43_s26, %s1465_s19  ;;  %p1471_p5 = scmp.lt.s32.totalorder %s1465_s19, %s1465_s19 }
   0xf   :  { %p1472_p6 = por %p1471_p5, %p1470_p4 }
  0x11   :  { %p1473_p7 = pnand %p1472_p6, %p1466_p3 }
  0x13   :  { %1476 = shalt.err (!%p1473_p7)
}
  0x14   :  { %s1643_s20 = smov 128   ;;  %s1644_s21 = smov 8  }
  0x15   :  { %48 = dma.hbm_to_vmem [thread:$0]  %s2062_s2, 256, %s43_s26, [#allocation6], %s1643_s20, %s1643_s20, %s1644_s21  }
  0x16   :  { %s1477_s27 = scalar_lea.hbm %s2066_s6, 16 }
  0x17   :  { %p1478_p8 = scmp.ne.s32.totalorder %s2066_s6, %s1477_s27  ;;  %p1481_p9 = scmp.lt.u32.totalorder %s1477_s27, %s2066_s6 }
  0x19   :  { %p1483_p10 = pnand %p1481_p9, %p1478_p8 }
  0x1b   :  { %1486 = shalt.err (!%p1483_p10)
}
  0x1c   :  { %s1487_s16 = scalar_lea.vmem %s1733_s28, 16  ;;  %s1491_s2 = scalar_lea.vmem %s1733_s28, 32 }
  0x1d   :  { %p1488_p11 = scmp.ne.s32.totalorder %s1733_s28, %s1487_s16  ;;  %p1492_p12 = scmp.lt.s32.totalorder %s1733_s28, %s1733_s28 }
  0x1e   :  { %p1493_p13 = scmp.lt.s32.totalorder %s1491_s2, %s1487_s16 }
  0x20   :  { %p1494_p0 = por %p1493_p13, %p1492_p12 }
  0x22   :  { %p1495_p1 = pnand %p1494_p0, %p1488_p11 }
  0x24   :  { %1498 = shalt.err (!%p1495_p1)
}
  0x25   :  { %74 = dma.hbm_to_vmem [thread:$0]  %s2066_s6, 16, %s1733_s28, [#allocation9]  }
  0x26   :  { %s1645_s18 = smov [#allocation11]   ;;  %s1646_s22 = smov [#allocation2]  }
  0x27   :  { %s91_s19 = sshll.u32 %s1645_s18, 4  ;;  %s30_s23 = sshll.u32 %s1646_s22, 4  ;;  %s92_s19 = int_to_ptr.vmem [resolvable:$true] %s91_s19  ;;  %s1768_s23 = int_to_ptr.vmem [resolvable:$true] %s30_s23 }
  0x28   :  { %s1499_s27 = scalar_lea.hbm %s2068_s8, 16 }
  0x29   :  { %p1500_p2 = scmp.ne.s32.totalorder %s2068_s8, %s1499_s27  ;;  %p1503_p3 = scmp.lt.u32.totalorder %s1499_s27, %s2068_s8 }
  0x2b   :  { %p1505_p4 = pnand %p1503_p3, %p1500_p2 }
  0x2d   :  { %1508 = shalt.err (!%p1505_p4)
}
  0x2e   :  { %s1509_s6 = scalar_lea.vmem %s92_s19, 16  ;;  %s1513_s28 = scalar_lea.vmem %s92_s19, 32 }
  0x2f   :  { %p1510_p5 = scmp.ne.s32.totalorder %s92_s19, %s1509_s6  ;;  %p1514_p6 = scmp.lt.s32.totalorder %s92_s19, %s92_s19 }
  0x30   :  { %p1515_p7 = scmp.lt.s32.totalorder %s1513_s28, %s1509_s6 }
  0x32   :  { %p1516_p8 = por %p1515_p7, %p1514_p6 }
  0x34   :  { %p1517_p9 = pnand %p1516_p8, %p1510_p5 }
  0x36   :  { %1520 = shalt.err (!%p1517_p9)
}
  0x37   :  { %94 = dma.hbm_to_vmem [thread:$0]  %s2068_s8, 16, %s92_s19, [#allocation12]  }
  0x38   :  { %s1521_s18 = scalar_lea.hbm %s2061_s1, 256 }
  0x39   :  { %p1522_p10 = scmp.ne.s32.totalorder %s2061_s1, %s1521_s18  ;;  %p1525_p11 = scmp.lt.u32.totalorder %s1521_s18, %s2061_s1 }
  0x3b   :  { %p1527_p12 = pnand %p1525_p11, %p1522_p10 }
  0x3d   :  { %1530 = shalt.err (!%p1527_p12)
}
  0x3e   :  { %s1531_s29 = scalar_lea.vmem %s1768_s23, 256  ;;  %p1536_p0 = scmp.lt.s32.totalorder %s1768_s23, %s1768_s23 }
  0x3f   :  { %p1532_p13 = scmp.ne.s32.totalorder %s1768_s23, %s1531_s29  ;;  %p1537_p1 = scmp.lt.s32.totalorder %s1531_s29, %s1531_s29 }
  0x41   :  { %p1538_p2 = por %p1537_p1, %p1536_p0 }
  0x43   :  { %p1539_p3 = pnand %p1538_p2, %p1532_p13 }
  0x45   :  { %1542 = shalt.err (!%p1539_p3)
}
  0x46   :  { %36 = dma.hbm_to_vmem [thread:$0]  %s2061_s1, 256, %s1768_s23, [#allocation3], %s1643_s20, %s1643_s20, %s1644_s21  }
  0x47   :  { %s1647_s30 = smov [#allocation7]   ;;  %s1648_s15 = smov [#allocation10]  }
  0x48   :  { %s54_s14 = sshll.u32 %s1647_s30, 4  ;;  %s81_s6 = sshll.u32 %s1648_s15, 4  ;;  %s55_s14 = int_to_ptr.vmem [resolvable:$true] %s54_s14  ;;  %s82_s6 = int_to_ptr.vmem [resolvable:$true] %s81_s6 }
  0x49   :  { %s1543_s2 = scalar_lea.hbm %s2063_s3, 256 }
  0x4a   :  { %p1544_p4 = scmp.ne.s32.totalorder %s2063_s3, %s1543_s2  ;;  %p1547_p5 = scmp.lt.u32.totalorder %s1543_s2, %s2063_s3 }
  0x4c   :  { %p1549_p6 = pnand %p1547_p5, %p1544_p4 }
  0x4e   :  { %1552 = shalt.err (!%p1549_p6)
}
  0x4f   :  { %s1553_s1 = scalar_lea.vmem %s55_s14, 256  ;;  %p1558_p8 = scmp.lt.s32.totalorder %s55_s14, %s55_s14 }
  0x50   :  { %p1554_p7 = scmp.ne.s32.totalorder %s55_s14, %s1553_s1  ;;  %p1559_p9 = scmp.lt.s32.totalorder %s1553_s1, %s1553_s1 }
  0x52   :  { %p1560_p10 = por %p1559_p9, %p1558_p8 }
  0x54   :  { %p1561_p11 = pnand %p1560_p10, %p1554_p7 }
  0x56   :  { %1564 = shalt.err (!%p1561_p11)
}
  0x57   :  { %60 = dma.hbm_to_vmem [thread:$0]  %s2063_s3, 256, %s55_s14, [#allocation6], %s1643_s20, %s1643_s20, %s1644_s21  }
  0x58   :  { %s1565_s29 = scalar_lea.hbm %s2067_s7, 16 }
  0x59   :  { %p1566_p12 = scmp.ne.s32.totalorder %s2067_s7, %s1565_s29  ;;  %p1569_p13 = scmp.lt.u32.totalorder %s1565_s29, %s2067_s7 }
  0x5b   :  { %p1571_p0 = pnand %p1569_p13, %p1566_p12 }
  0x5d   :  { %1574 = shalt.err (!%p1571_p0)
}
  0x5e   :  { %s1575_s28 = scalar_lea.vmem %s82_s6, 16  ;;  %s1579_s16 = scalar_lea.vmem %s82_s6, 32 }
  0x5f   :  { %p1576_p1 = scmp.ne.s32.totalorder %s82_s6, %s1575_s28  ;;  %p1580_p2 = scmp.lt.s32.totalorder %s82_s6, %s82_s6 }
  0x60   :  { %p1581_p3 = scmp.lt.s32.totalorder %s1579_s16, %s1575_s28 }
  0x62   :  { %p1582_p4 = por %p1581_p3, %p1580_p2 }
  0x64   :  { %p1583_p5 = pnand %p1582_p4, %p1576_p1 }
  0x66   :  { %1586 = shalt.err (!%p1583_p5)
}
  0x67   :  { %84 = dma.hbm_to_vmem [thread:$0]  %s2067_s7, 16, %s82_s6, [#allocation9]  }
  0x68   :  { %s1649_s2 = smov [#allocation13]   ;;  %s1587_s22 = scalar_lea.hbm %s2071_s11, 256 }
  0x69   :  { %s104_s26 = sshll.u32 %s1649_s2, 4  ;;  %p1588_p6 = scmp.ne.s32.totalorder %s2071_s11, %s1587_s22  ;;  %s105_s26 = int_to_ptr.vmem [resolvable:$true] %s104_s26 }
  0x6a   :  { %p1591_p7 = scmp.lt.u32.totalorder %s1587_s22, %s2071_s11 }
  0x6c   :  { %p1593_p8 = pnand %p1591_p7, %p1588_p6 }
  0x6e   :  { %1596 = shalt.err (!%p1593_p8)
}
  0x6f   :  { %s1597_s27 = scalar_lea.vmem %s105_s26, 256  ;;  %p1602_p10 = scmp.lt.s32.totalorder %s105_s26, %s105_s26 }
  0x70   :  { %p1598_p9 = scmp.ne.s32.totalorder %s105_s26, %s1597_s27  ;;  %p1603_p11 = scmp.lt.s32.totalorder %s1597_s27, %s1597_s27 }
  0x72   :  { %p1604_p12 = por %p1603_p11, %p1602_p10 }
  0x74   :  { %p1605_p13 = pnand %p1604_p12, %p1598_p9 }
  0x76   :  { %1608 = shalt.err (!%p1605_p13)
}
  0x77   :  { %s1650_s7 = smov 64   ;;  %s1651_s6 = smov 4  }
  0x78   :  { %110 = dma.hbm_to_vmem [thread:$0]  %s2071_s11, 256, %s105_s26, [#allocation12], %s1650_s7, %s1650_s7, %s1651_s6  }
  0x79   :  { %1631 = dma.done.wait [#allocation3], 256  }
  0x7a   :  { %1632 = vsyncadd [#allocation3], 4294967040 }
  0x7b   :  { %1633 = dma.done.wait [#allocation6], 512  }
  0x7c   :  { %1634 = vsyncadd [#allocation6], 4294966784 }
  0x7d   :  { %1635 = dma.done.wait [#allocation9], 32  }
  0x7e   :  { %1636 = vsyncadd [#allocation9], 4294967264 }
  0x7f   :  { %1637 = dma.done.wait [#allocation12], 272  }
  0x80   :  { %1638 = vsyncadd [#allocation12], 4294967024  ;;  %v1846_v0 = vld [vmem:[%s2060_s0] sm:$0xff]  ;;  %vm146_vm0 = vcmask 261120   ;;  %v1851_v1 = vld [vmem:[%s2060_s0 + $0x8] sm:$0xff]  ;;  %v1652_v9 = vmov 0  }
  0x81   :  { %v144_v2 = vmul.f32 %v1846_v0, %v1846_v0  ;;  %v145_v3 = vmul.f32 %v1851_v1, %v1851_v1  ;;  %v1393_v6 = vld [vmem:[%s2069_s9 + $0x4] ss:$8 sps:$4 sm:$0xff]   ;;  %v1395_v7 = vld [vmem:[%s2069_s9] ss:$8 sps:$4 sm:$0xff]   ;;  %v1396_v8 = vld [vmem:[%s2069_s9 + $0x14] ss:$8 sps:$4 sm:$0xff]   ;;  %230 = vmatprep.mubr.bf16.mxu0 %v1652_v9 }
  0x82   :  { %198 = vmatprep.subr.bf16.mxu0 %v1393_v6  ;;  %v1398_v10 = vld [vmem:[%s2069_s9 + $0x10] ss:$8 sps:$4 sm:$0xff]   ;;  %v139_v11 = vld [vmem:[#allocation7] sm:$0xff]  ;;  %s1653_s18 = smov 96   ;;  %v140_v13 = vld [vmem:[#allocation7 + $0x8] sm:$0xff]  ;;  %s1654_s9 = smov 32  }
  0x83   :  { %v147_v4 = vsel %vm146_vm0, %v144_v2, 0.0  ;;  %v150_v5 = vsel %vm146_vm0, %v145_v3, 0.0  ;;  %199 = vmatpush1.bf16.msra.mxu0 %v1395_v7  ;;  %v1871_v12 = vld [vmem:[#allocation5] sm:$0xff]  ;;  %273 = vrot.lane.b32.xlu1 %v139_v11, %s1653_s18  ;;  %v1877_v14 = vld [vmem:[#allocation5 + $0x8] sm:$0xff]  ;;  %v1655_v47 = vmov 0.0   ;;  %s1656_s22 = smov 120  }
  0x84   :  { %148 = vadd.xlane.f32.xlu0 %v147_v4  ;;  %200 = vmatprep.subr.bf16.mxu0 %v1396_v8  ;;  %v1192_v24 = vld [vmem:[#allocation10] ss:$0 sm:$0xff]  ;;  %vm1657_vm1 = vmmov 0   ;;  %s1658_s1 = smov 112   ;;  %s1659_s23 = smov 104   ;;  %vm366_vm2 = vcmask 64512  }
  0x85   :  { %1250 = vmatprep.subr.bf16.mxu1 %v1655_v47  ;;  %1252 = vmatprep.mubr.msk.bf16.mxu1 %vm1657_vm1, %v1655_v47  ;;  %vm588_vm3 = vcmask 130048   ;;  %s1660_s24 = smov 16   ;;  %s1661_s8 = smov 24   ;;  %vm885_vm4 = vcmask 195584   ;;  %vm1114_vm5 = vcmask 523264  }
  0x87   :  { %201 = vmatpush1.bf16.msra.mxu0 %v1398_v10  ;;  %275 = vrot.lane.b32.xlu1 %v140_v13, %s1653_s18 }
  0x88   :  { %151 = vadd.xlane.f32.xlu0 %v150_v5  ;;  %1256 = vmatprep.subr.bf16.mxu0 %v1655_v47 }
  0x8b   :  { %267 = vrot.lane.b32.xlu1 %v1877_v14, %s1650_s7 }
  0x9e   :  { %265 = vrot.lane.b32.xlu0 %v1871_v12, %s1650_s7 }
  0xf5   :  { %v274_v29 = vpop.permute.xlu1 %273 }
  0xf9   :  { %v276_v35 = vpop.permute.xlu1 %275 }
  0xfd   :  { %v268_v39 = vpop.permute.xlu1 %267 }
 0x111   :  { %v149_v15 = vpop.xlane.xlu0 %148 }
 0x112   :  { %v154_v16 = vmul.f32 0.03125, %v149_v15 }
 0x114   :  { %v156_v17 = vadd.f32 1e-06, %v154_v16 }
 0x115   :  { %v152_v18 = vpop.xlane.xlu0 %151 }
 0x116   :  { %1407 = vrsqrt.f32 %v156_v17  ;;  %v155_v19 = vmul.f32 0.03125, %v152_v18 }
 0x118   :  { %v157_v20 = vadd.f32 1e-06, %v155_v19 }
 0x119   :  { %v266_v40 = vpop.permute.xlu0 %265 }
 0x11a   :  { %1409 = vrsqrt.f32 %v157_v20 }
 0x120   :  { %v1408_v21 = vpop.eup %1407 }
 0x121   :  { %v160_v22 = vmul.f32 %v1408_v21, %v1846_v0 }
 0x123   :  { %v168_v26 = vmul.f32 %v1192_v24, %v160_v22 }
 0x124   :  { %v1410_v23 = vpop.eup %1409 }
 0x125   :  { %v161_v25 = vmul.f32 %v1410_v23, %v1851_v1 }
 0x127   :  { %v169_v27 = vmul.f32 %v1192_v24, %v161_v25 }
 0x129   :  { %v170_v28 = vpack.c.bf16 %v169_v27, %v168_v26 }
 0x12b   :  { %1197 = vmatmul.mubr.msk.bf16.vlgmr.msra.gmra.mrb[0].mxu0 %vm146_vm0, %v170_v28 }
 0x12c   :  { %1258 = vmatprep.mubr.msk.bf16.mxu0 %vm1657_vm1, %v1655_v47 }
 0x1fe   :  { %v232_v30 = vpop.f32.mrb[0].mxu0 }
 0x1ff   :  { %v1884_v31 = vpop.f32.mrb[1].mxu0  ;;  %v279_v32 = vmul.f32 %v274_v29, %v232_v30  ;;  %v271_v42 = vmul.f32 %v266_v40, %v232_v30  ;;  %v241_v59 = vmul.f32 %v232_v30, %v1871_v12  ;;  %v142_v40 = vld [vmem:[#allocation2 + $0x8] sm:$0xff] }
 0x200   :  { %v236_v33 = vpop.f32.mrb[2].mxu0 }
 0x201   :  { %283 = vrot.lane.b32.xlu1 %v279_v32, %s1653_s18  ;;  %v1887_v34 = vpop.f32.mrb[3].mxu0  ;;  %v280_v38 = vmul.f32 %v276_v35, %v236_v33  ;;  %v272_v43 = vmul.f32 %v268_v39, %v236_v33  ;;  %v242_v60 = vmul.f32 %v236_v33, %v1877_v14 }
 0x202   :  { %v359_v36 = vpack.c.bf16 %v1887_v34, %v1884_v31  ;;  %v1893_v37 = vpack.i.bf16 %v1887_v34, %v1884_v31 }
 0x205   :  { %285 = vrot.lane.b32.xlu1 %v280_v38, %s1653_s18 }
 0x209   :  { %245 = vrot.lane.b32.xlu1 %v139_v11, %s1654_s9 }
 0x20d   :  { %247 = vrot.lane.b32.xlu1 %v140_v13, %s1654_s9 }
 0x273   :  { %v284_v41 = vpop.permute.xlu1 %283 }
 0x274   :  { %v289_v45 = vadd.f32 %v284_v41, %v271_v42 }
 0x277   :  { %v286_v44 = vpop.permute.xlu1 %285 }
 0x278   :  { %v290_v46 = vadd.f32 %v286_v44, %v272_v43 }
 0x27a   :  { %v1348_v48 = vpack.i.bf16 %v290_v46, %v289_v45  ;;  %v335_v49 = vpack.c.bf16 %v290_v46, %v289_v45 }
 0x27b   :  { %v246_v50 = vpop.permute.xlu1 %245 }
 0x27c   :  { %v251_v51 = vmul.f32 %v246_v50, %v232_v30  ;;  %1349 = vrot.lane.b32.xlu1 %v1348_v48, %s1656_s22 }
 0x27e   :  { %255 = vrot.lane.b32.xlu0 %v251_v51, %s1653_s18 }
 0x27f   :  { %v248_v52 = vpop.permute.xlu1 %247 }
 0x280   :  { %v252_v53 = vmul.f32 %v248_v52, %v236_v33  ;;  %v141_v33 = vld [vmem:[#allocation2] sm:$0xff] }
 0x282   :  { %1354 = vrot.lane.b32.xlu0 %v1348_v48, %s1658_s1  ;;  %257 = vrot.lane.b32.xlu1 %v252_v53, %s1653_s18 }
 0x286   :  { %1359 = vrot.lane.b32.xlu1 %v1348_v48, %s1659_s23  ;;  %364 = vrot.lane.b32.xlu0 %v335_v49, %s1650_s7 }
 0x2ee   :  { %v1350_v54 = vpop.permute.xlu1 %1349 }
 0x2ef   :  { %v1352_v55 = vunpack.i.h.bf16 %v1350_v54  ;;  %v1351_v56 = vunpack.i.l.bf16 %v1350_v54 }
 0x2f0   :  { %v256_v57 = vpop.permute.xlu0 %255 }
 0x2f1   :  { %v336_v58 = vpack.c.bf16 %v1352_v55, %v1351_v56  ;;  %v261_v63 = vadd.f32 %v256_v57, %v241_v59 }
 0x2f3   :  { %415 = vrot.lane.b32.xlu1 %v336_v58, %s1650_s7 }
 0x2f4   :  { %v258_v61 = vpop.permute.xlu1 %257  ;;  %v1355_v62 = vpop.permute.xlu0 %1354 }
 0x2f5   :  { %v262_v2 = vadd.f32 %v258_v61, %v242_v60  ;;  %v1357_v3 = vunpack.i.h.bf16 %v1355_v62  ;;  %v1356_v4 = vunpack.i.l.bf16 %v1355_v62 }
 0x2f7   :  { %v1363_v5 = vpack.i.bf16 %v262_v2, %v261_v63  ;;  %v337_v6 = vpack.c.bf16 %v1357_v3, %v1356_v4  ;;  %v311_v9 = vpack.c.bf16 %v262_v2, %v261_v63 }
 0x2f8   :  { %v1360_v7 = vpop.permute.xlu1 %1359  ;;  %v365_v8 = vpop.permute.xlu0 %364 }
 0x2f9   :  { %v1362_v10 = vunpack.i.h.bf16 %v1360_v7  ;;  %v1361_v11 = vunpack.i.l.bf16 %v1360_v7  ;;  %1364 = vrot.lane.b32.xlu0 %v1363_v5, %s1656_s22  ;;  %465 = vrot.lane.b32.xlu1 %v337_v6, %s1650_s7  ;;  %v371_v12 = vsel %vm366_vm2, %v365_v8, 0 }
 0x2fa   :  { %1251 = vmatpush3.bf16.xpose.msra.mxu1 %v371_v12 }
 0x2fb   :  { %v338_v13 = vpack.c.bf16 %v1362_v10, %v1361_v11  ;;  %1262 = vmatprep.subr.bf16.mxu1 %v1655_v47 }
 0x2fd   :  { %515 = vrot.lane.b32.xlu0 %v338_v13, %s1650_s7  ;;  %1369 = vrot.lane.b32.xlu1 %v1363_v5, %s1658_s1 }
 0x301   :  { %1374 = vrot.lane.b32.xlu0 %v1363_v5, %s1659_s23  ;;  %1253 = vmatmul.mubr.msk.bf16.vlgmr.msra.gmra.mrb[0].mxu1 %vm366_vm2, %v311_v9 }
 0x302   :  { %1264 = vmatprep.mubr.msk.bf16.mxu1 %vm1657_vm1, %v1655_v47 }
 0x365   :  { %v416_v14 = vpop.permute.xlu1 %415 }
 0x366   :  { %v421_v15 = vsel %vm366_vm2, %v416_v14, 0 }
 0x367   :  { %1257 = vmatpush3.bf16.xpose.msra.mxu0 %v421_v15 }
 0x368   :  { %1268 = vmatprep.subr.bf16.mxu0 %v1655_v47 }
 0x36b   :  { %v1365_v16 = vpop.permute.xlu0 %1364  ;;  %v466_v17 = vpop.permute.xlu1 %465 }
 0x36c   :  { %v1367_v18 = vunpack.i.h.bf16 %v1365_v16  ;;  %v1366_v19 = vunpack.i.l.bf16 %v1365_v16  ;;  %v471_v20 = vsel %vm366_vm2, %v466_v17, 0 }
 0x36d   :  { %1263 = vmatpush3.bf16.xpose.msra.mxu1 %v471_v20 }
 0x36e   :  { %v312_v21 = vpack.c.bf16 %v1367_v18, %v1366_v19  ;;  %1274 = vmatprep.subr.bf16.mxu1 %v1655_v47 }
 0x36f   :  { %v516_v22 = vpop.permute.xlu0 %515  ;;  %v1370_v23 = vpop.permute.xlu1 %1369 }
 0x370   :  { %v521_v24 = vsel %vm366_vm2, %v516_v22, 0  ;;  %v1372_v25 = vunpack.i.h.bf16 %v1370_v23  ;;  %v1371_v26 = vunpack.i.l.bf16 %v1370_v23  ;;  %1259 = vmatmul.mubr.msk.bf16.vlgmr.msra.gmra.mrb[4].mxu0 %vm366_vm2, %v312_v21 }
 0x371   :  { %1269 = vmatpush3.bf16.xpose.msra.mxu0 %v521_v24  ;;  %1270 = vmatprep.mubr.msk.bf16.mxu0 %vm1657_vm1, %v1655_v47 }
 0x372   :  { %v313_v27 = vpack.c.bf16 %v1372_v25, %v1371_v26  ;;  %1280 = vmatprep.subr.bf16.mxu0 %v1655_v47 }
 0x373   :  { %v1375_v28 = vpop.permute.xlu0 %1374 }
 0x374   :  { %v1377_v29 = vunpack.i.h.bf16 %v1375_v28  ;;  %v1376_v30 = vunpack.i.l.bf16 %v1375_v28  ;;  %1265 = vmatmul.mubr.msk.bf16.vlgmr.msra.gmra.mrb[4].mxu1 %vm366_vm2, %v313_v27 }
 0x375   :  { %1275 = vmatpush3.bf16.msra.mxu1 %v359_v36  ;;  %1276 = vmatprep.mubr.msk.bf16.mxu1 %vm1657_vm1, %v1655_v47 }
 0x376   :  { %v314_v32 = vpack.c.bf16 %v1377_v29, %v1376_v30  ;;  %1286 = vmatprep.subr.bf16.mxu1 %v1655_v47 }
 0x378   :  { %1271 = vmatmul.mubr.msk.bf16.vlgmr.msra.gmra.mrb[8].mxu0 %vm366_vm2, %v314_v32 }
 0x379   :  { %1282 = vmatprep.mubr.msk.bf16.mxu0 %vm1657_vm1, %v1655_v47 }
 0x3d4   :  { %v407_v35 = vpop.f32.mrb[0].mxu1 }
 0x3d5   :  { %v564_v38 = vmul.f32 0.35355338, %v407_v35  ;;  %v1254_v39 = vpop.f32.mrb[1].mxu1 }
 0x3d6   :  { %v410_v41 = vpop.f32.mrb[2].mxu1 }
 0x3d7   :  { %v572_v42 = vadd.f32 %v564_v38, %v141_v33  ;;  %v565_v31 = vmul.f32 0.35355338, %v410_v41  ;;  %v1255_v34 = vpop.f32.mrb[3].mxu1 }
 0x3d9   :  { %v573_v36 = vadd.f32 %v565_v31, %v142_v40  ;;  %v580_v43 = vmax.f32 %v572_v42, -3.4028235e+38 }
 0x3db   :  { %v589_v44 = vsel %vm588_vm3, %v580_v43, -inf  ;;  %v581_v45 = vmax.f32 %v573_v36, -3.4028235e+38 }
 0x3dc   :  { %590 = vmax.xlane.f32.xlu1 %v589_v44 }
 0x3dd   :  { %v592_v46 = vsel %vm588_vm3, %v581_v45, -inf }
 0x3de   :  { %593 = vmax.xlane.f32.xlu0 %v592_v46 }
 0x443   :  { %v457_v48 = vpop.f32.mrb[4].mxu0 }
 0x444   :  { %v566_v49 = vmul.f32 0.35355338, %v457_v48  ;;  %v1260_v50 = vpop.f32.mrb[5].mxu0 }
 0x445   :  { %v460_v51 = vpop.f32.mrb[6].mxu0 }
 0x446   :  { %v574_v52 = vadd.f32 %v566_v49, %v141_v33  ;;  %v567_v53 = vmul.f32 0.35355338, %v460_v51  ;;  %v1261_v54 = vpop.f32.mrb[7].mxu0 }
 0x447   :  { %v507_v55 = vpop.f32.mrb[4].mxu1 }
 0x448   :  { %v575_v56 = vadd.f32 %v567_v53, %v142_v40  ;;  %v568_v57 = vmul.f32 0.35355338, %v507_v55  ;;  %v1266_v58 = vpop.f32.mrb[5].mxu1  ;;  %v582_v59 = vmax.f32 %v574_v52, -3.4028235e+38 }
 0x449   :  { %v510_v60 = vpop.f32.mrb[6].mxu1 }
 0x44a   :  { %v576_v61 = vadd.f32 %v568_v57, %v141_v33  ;;  %v569_v62 = vmul.f32 0.35355338, %v510_v60  ;;  %v1267_v63 = vpop.f32.mrb[7].mxu1  ;;  %v595_v2 = vsel %vm588_vm3, %v582_v59, -inf  ;;  %v583_v3 = vmax.f32 %v575_v56, -3.4028235e+38 }
 0x44b   :  { %596 = vmax.xlane.f32.xlu0 %v595_v2  ;;  %v557_v4 = vpop.f32.mrb[8].mxu0 }
 0x44c   :  { %v577_v5 = vadd.f32 %v569_v62, %v142_v40  ;;  %v570_v6 = vmul.f32 0.35355338, %v557_v4  ;;  %v1272_v7 = vpop.f32.mrb[9].mxu0  ;;  %v598_v8 = vsel %vm588_vm3, %v583_v3, -inf  ;;  %v584_v9 = vmax.f32 %v576_v61, -3.4028235e+38 }
 0x44d   :  { %v560_v10 = vpop.f32.mrb[10].mxu0  ;;  %599 = vmax.xlane.f32.xlu1 %v598_v8 }
 0x44e   :  { %v578_v11 = vadd.f32 %v570_v6, %v141_v33  ;;  %v571_v12 = vmul.f32 0.35355338, %v560_v10  ;;  %v1273_v13 = vpop.f32.mrb[11].mxu0  ;;  %v601_v14 = vsel %vm588_vm3, %v584_v9, -inf  ;;  %v585_v15 = vmax.f32 %v577_v5, -3.4028235e+38 }
 0x44f   :  { %602 = vmax.xlane.f32.xlu0 %v601_v14 }
 0x450   :  { %v1945_v16 = vadd.f32 %v571_v12, %v142_v40  ;;  %v604_v17 = vsel %vm588_vm3, %v585_v15, -inf  ;;  %v586_v18 = vmax.f32 %v578_v11, -3.4028235e+38 }
 0x451   :  { %605 = vmax.xlane.f32.xlu1 %v604_v17 }
 0x452   :  { %v607_v19 = vsel %vm588_vm3, %v586_v18, -inf  ;;  %v587_v20 = vmax.f32 %v1945_v16, -3.4028235e+38 }
 0x453   :  { %608 = vmax.xlane.f32.xlu0 %v607_v19 }
 0x454   :  { %v610_v21 = vsel %vm588_vm3, %v587_v20, -inf }
 0x455   :  { %611 = vmax.xlane.f32.xlu1 %v610_v21 }
 0x469   :  { %v591_v22 = vpop.xlane.xlu1 %590 }
 0x46a   :  { %v613_v23 = vsub.f32 %v580_v43, %v591_v22 }
 0x46b   :  { %v594_v24 = vpop.xlane.xlu0 %593 }
 0x46c   :  { %v621_v25 = vmul.f32 1.442695, %v613_v23  ;;  %v614_v26 = vsub.f32 %v581_v45, %v594_v24 }
 0x46e   :  { %1411 = vpow2.f32 %v621_v25  ;;  %v623_v27 = vmul.f32 1.442695, %v614_v26 }
 0x470   :  { %1413 = vpow2.f32 %v623_v27 }
 0x478   :  { %v1412_v28 = vpop.eup %1411 }
 0x479   :  { %v637_v29 = vsel %vm588_vm3, %v1412_v28, 0.0 }
 0x47a   :  { %v1414_v30 = vpop.eup %1413  ;;  %638 = vadd.xlane.f32.xlu0 %v637_v29 }
 0x47b   :  { %v640_v32 = vsel %vm588_vm3, %v1414_v30, 0.0 }
 0x47c   :  { %641 = vadd.xlane.f32.xlu1 %v640_v32 }
 0x4d8   :  { %v597_v33 = vpop.xlane.xlu0 %596 }
 0x4d9   :  { %v615_v35 = vsub.f32 %v582_v59, %v597_v33 }
 0x4da   :  { %v600_v38 = vpop.xlane.xlu1 %599 }
 0x4db   :  { %v625_v39 = vmul.f32 1.442695, %v615_v35  ;;  %v616_v40 = vsub.f32 %v583_v3, %v600_v38 }
 0x4dc   :  { %v603_v41 = vpop.xlane.xlu0 %602 }
 0x4dd   :  { %1415 = vpow2.f32 %v625_v39  ;;  %v627_v42 = vmul.f32 1.442695, %v616_v40  ;;  %v617_v31 = vsub.f32 %v584_v9, %v603_v41 }
 0x4de   :  { %v606_v34 = vpop.xlane.xlu1 %605 }
 0x4df   :  { %1417 = vpow2.f32 %v627_v42  ;;  %v629_v36 = vmul.f32 1.442695, %v617_v31  ;;  %v618_v43 = vsub.f32 %v585_v15, %v606_v34 }
 0x4e0   :  { %v609_v44 = vpop.xlane.xlu0 %608 }
 0x4e1   :  { %1419 = vpow2.f32 %v629_v36  ;;  %v631_v45 = vmul.f32 1.442695, %v618_v43  ;;  %v619_v46 = vsub.f32 %v586_v18, %v609_v44 }
 0x4e2   :  { %v612_v59 = vpop.xlane.xlu1 %611 }
 0x4e3   :  { %1421 = vpow2.f32 %v631_v45  ;;  %v633_v48 = vmul.f32 1.442695, %v619_v46  ;;  %v620_v62 = vsub.f32 %v587_v20, %v612_v59 }
 0x4e5   :  { %1423 = vpow2.f32 %v633_v48  ;;  %v635_v2 = vmul.f32 1.442695, %v620_v62 }
 0x4e7   :  { %v1416_v49 = vpop.eup %1415 }
 0x4e8   :  { %v643_v50 = vsel %vm588_vm3, %v1416_v49, 0.0 }
 0x4e9   :  { %v1418_v51 = vpop.eup %1417  ;;  %644 = vadd.xlane.f32.xlu0 %v643_v50 }
 0x4ea   :  { %v646_v52 = vsel %vm588_vm3, %v1418_v51, 0.0 }
 0x4eb   :  { %v1420_v53 = vpop.eup %1419  ;;  %647 = vadd.xlane.f32.xlu1 %v646_v52 }
 0x4ec   :  { %v649_v54 = vsel %vm588_vm3, %v1420_v53, 0.0 }
 0x4ed   :  { %v1422_v55 = vpop.eup %1421  ;;  %650 = vadd.xlane.f32.xlu0 %v649_v54 }
 0x4ee   :  { %v652_v56 = vsel %vm588_vm3, %v1422_v55, 0.0 }
 0x4ef   :  { %v1957_v57 = vpop.eup %1423  ;;  %653 = vadd.xlane.f32.xlu1 %v652_v56  ;;  %v1400_v56 = vld [vmem:[%s2070_s10 + $0x8] sm:$0xff]  }
 0x4f0   :  { %v655_v58 = vsel %vm588_vm3, %v1957_v57, 0.0 }
 0x4f1   :  { %656 = vadd.xlane.f32.xlu0 %v655_v58 }
 0x500   :  { %1384 = vrot.lane.b32.xlu1 %v1893_v37, %s1658_s1 }
 0x507   :  { %1379 = vrot.lane.b32.xlu0 %v1893_v37, %s1656_s22  ;;  %v639_v60 = vpop.xlane.xlu0 %638 }
 0x508   :  { %1425 = vrcp.f32 %v639_v60 }
 0x509   :  { %v642_v61 = vpop.xlane.xlu1 %641 }
 0x50a   :  { %1427 = vrcp.f32 %v642_v61 }
 0x50b   :  { %1429 = vpow2.f32 %v635_v2 }
 0x512   :  { %v1426_v63 = vpop.eup %1425 }
 0x513   :  { %v669_v4 = vmul.f32 %v1426_v63, %v1412_v28 }
 0x514   :  { %v1428_v3 = vpop.eup %1427 }
 0x515   :  { %v670_v5 = vmul.f32 %v1428_v3, %v1414_v30  ;;  %v1430_v7 = vpop.eup %1429 }
 0x516   :  { %v658_v8 = vsel %vm588_vm3, %v1430_v7, 0.0 }
 0x517   :  { %v677_v6 = vpack.c.bf16 %v670_v5, %v669_v4 }
 0x519   :  { %1277 = vmatmul.mubr.msk.bf16.vlgmr.msra.gmra.mrb[8].mxu1 %vm588_vm3, %v677_v6 }
 0x51a   :  { %1288 = vmatprep.mubr.msk.bf16.mxu1 %vm1657_vm1, %v1655_v47 }
 0x524   :  { %659 = vadd.xlane.f32.xlu1 %v658_v8 }
 0x535   :  { %1389 = vrot.lane.b32.xlu1 %v1893_v37, %s1659_s23 }
 0x576   :  { %v645_v9 = vpop.xlane.xlu0 %644 }
 0x577   :  { %1431 = vrcp.f32 %v645_v9 }
 0x578   :  { %v648_v10 = vpop.xlane.xlu1 %647 }
 0x579   :  { %1433 = vrcp.f32 %v648_v10 }
 0x57a   :  { %v651_v11 = vpop.xlane.xlu0 %650 }
 0x57b   :  { %1435 = vrcp.f32 %v651_v11 }
 0x57c   :  { %v654_v12 = vpop.xlane.xlu1 %653 }
 0x57d   :  { %1437 = vrcp.f32 %v654_v12 }
 0x57e   :  { %v657_v13 = vpop.xlane.xlu0 %656 }
 0x57f   :  { %1439 = vrcp.f32 %v657_v13 }
 0x580   :  { %v1385_v14 = vpop.permute.xlu1 %1384 }
 0x581   :  { %v1387_v15 = vunpack.i.h.bf16 %v1385_v14  ;;  %v1386_v16 = vunpack.i.l.bf16 %v1385_v14  ;;  %v1432_v17 = vpop.eup %1431 }
 0x582   :  { %v1380_v18 = vpop.permute.xlu0 %1379  ;;  %v671_v25 = vmul.f32 %v1432_v17, %v1416_v49 }
 0x583   :  { %v1434_v19 = vpop.eup %1433  ;;  %v361_v20 = vpack.c.bf16 %v1387_v15, %v1386_v16  ;;  %v1382_v21 = vunpack.i.h.bf16 %v1380_v18  ;;  %v1381_v22 = vunpack.i.l.bf16 %v1380_v18 }
 0x584   :  { %v672_v23 = vmul.f32 %v1434_v19, %v1418_v51 }
 0x585   :  { %v1436_v37 = vpop.eup %1435  ;;  %v360_v24 = vpack.c.bf16 %v1382_v21, %v1381_v22  ;;  %1287 = vmatpush3.bf16.msra.mxu1 %v361_v20 }
 0x586   :  { %1298 = vmatprep.subr.bf16.mxu1 %v1655_v47  ;;  %v673_v27 = vmul.f32 %v1436_v37, %v1420_v53  ;;  %v678_v29 = vpack.c.bf16 %v672_v23, %v671_v25 }
 0x587   :  { %v1438_v26 = vpop.eup %1437  ;;  %1281 = vmatpush3.bf16.msra.mxu0 %v360_v24  ;;  %v1402_v24 = vld [vmem:[#allocation13 + $0x8] sm:$0xff]  }
 0x588   :  { %v674_v28 = vmul.f32 %v1438_v26, %v1422_v55  ;;  %1292 = vmatprep.subr.bf16.mxu0 %v1655_v47  ;;  %v1399_v55 = vld [vmem:[%s2070_s10] sm:$0xff]  }
 0x589   :  { %v1440_v40 = vpop.eup %1439 }
 0x58a   :  { %1283 = vmatmul.mubr.msk.bf16.vlgmr.msra.gmra.mrb[12].mxu0 %vm588_vm3, %v678_v29  ;;  %v679_v30 = vpack.c.bf16 %v674_v28, %v673_v27  ;;  %v675_v42 = vmul.f32 %v1440_v40, %v1957_v57 }
 0x58b   :  { %1294 = vmatprep.mubr.msk.bf16.mxu0 %vm1657_vm1, %v1655_v47 }
 0x58c   :  { %1289 = vmatmul.mubr.msk.bf16.vlgmr.msra.gmra.mrb[12].mxu1 %vm588_vm3, %v679_v30 }
 0x58d   :  { %1302 = vmatprep.mubr.msk.bf16.mxu1 %vm1657_vm1, %v1655_v47  ;;  %1299 = vmatpush3.bf16.msra.mxu1 %v1399_v55 }
 0x58e   :  { %1300 = vmatprep.subr.bf16.mxu1 %v1655_v47 }
 0x591   :  { %1301 = vmatpush3.bf16.msra.mxu1 %v1400_v56 }
 0x592   :  { %1314 = vmatprep.subr.bf16.mxu1 %v1655_v47 }
 0x5b1   :  { %v660_v32 = vpop.xlane.xlu1 %659 }
 0x5b2   :  { %1441 = vrcp.f32 %v660_v32 }
 0x5b5   :  { %v1390_v33 = vpop.permute.xlu1 %1389 }
 0x5b6   :  { %v1392_v35 = vunpack.i.h.bf16 %v1390_v33  ;;  %v1391_v38 = vunpack.i.l.bf16 %v1390_v33 }
 0x5b8   :  { %v362_v39 = vpack.c.bf16 %v1392_v35, %v1391_v38  ;;  %v1210_v38 = vld [vmem:[#allocation11] ss:$0 sm:$0xff] }
 0x5ba   :  { %1293 = vmatpush3.bf16.msra.mxu0 %v362_v39 }
 0x5bb   :  { %1306 = vmatprep.subr.bf16.mxu0 %v1655_v47 }
 0x5bc   :  { %v1442_v41 = vpop.eup %1441 }
 0x5bd   :  { %v676_v31 = vmul.f32 %v1442_v41, %v1430_v7  ;;  %v1206_v7 = vld [vmem:[%s2064_s4] ss:$0 sm:$0xff] }
 0x5bf   :  { %v680_v34 = vpack.c.bf16 %v676_v31, %v675_v42  ;;  %v1403_v31 = vld [vmem:[%s2072_s12] sm:$0xff]  }
 0x5c1   :  { %1295 = vmatmul.mubr.msk.bf16.vlgmr.msra.gmra.mrb[16].mxu0 %vm588_vm3, %v680_v34  ;;  %v1404_v34 = vld [vmem:[%s2072_s12 + $0x8] sm:$0xff]  }
 0x5c2   :  { %1310 = vmatprep.mubr.msk.bf16.mxu0 %vm1657_vm1, %v1655_v47 }
 0x5ec   :  { %v718_v36 = vpop.f32.mrb[8].mxu1 }
 0x5ed   :  { %v1278_v43 = vpop.f32.mrb[9].mxu1 }
 0x5ee   :  { %v721_v44 = vpop.f32.mrb[10].mxu1  ;;  %v1406_v43 = vld [vmem:[%s2072_s12 + $0x18] sm:$0xff]  }
 0x5ef   :  { %v1279_v45 = vpop.f32.mrb[11].mxu1 }
 0x65d   :  { %v762_v46 = vpop.f32.mrb[12].mxu0 }
 0x65e   :  { %859 = vrot.lane.b32.xlu0 %v762_v46, %s1644_s21  ;;  %v1284_v48 = vpop.f32.mrb[13].mxu0 }
 0x65f   :  { %v765_v49 = vpop.f32.mrb[14].mxu0  ;;  %v806_v50 = vpop.f32.mrb[12].mxu1 }
 0x660   :  { %861 = vrot.lane.b32.xlu1 %v765_v49, %s1644_s21  ;;  %v1285_v51 = vpop.f32.mrb[15].mxu0  ;;  %v1290_v52 = vpop.f32.mrb[13].mxu1 }
 0x661   :  { %v809_v53 = vpop.f32.mrb[14].mxu1 }
 0x662   :  { %867 = vrot.lane.b32.xlu0 %v806_v50, %s1660_s24  ;;  %v1291_v54 = vpop.f32.mrb[15].mxu1 }
 0x664   :  { %869 = vrot.lane.b32.xlu1 %v809_v53, %s1660_s24 }
 0x694   :  { %v850_v57 = vpop.f32.mrb[16].mxu0 }
 0x695   :  { %v1296_v58 = vpop.f32.mrb[17].mxu0  ;;  %875 = vrot.lane.b32.xlu0 %v850_v57, %s1661_s8 }
 0x696   :  { %v853_v59 = vpop.f32.mrb[18].mxu0 }
 0x697   :  { %v1297_v60 = vpop.f32.mrb[19].mxu0  ;;  %877 = vrot.lane.b32.xlu1 %v853_v59, %s1661_s8 }
 0x6d0   :  { %v860_v61 = vpop.permute.xlu0 %859 }
 0x6d1   :  { %v881_v3 = vsel %vm366_vm2, %v718_v36, %v860_v61  ;;  %v1405_v36 = vld [vmem:[%s2072_s12 + $0x10] sm:$0xff]   ;;  %s1662_s12 = smov [#allocation14]  }
 0x6d2   :  { %v862_v62 = vpop.permute.xlu1 %861 }
 0x6d3   :  { %v882_v6 = vsel %vm366_vm2, %v721_v44, %v862_v62 }
 0x6d4   :  { %v868_v63 = vpop.permute.xlu0 %867 }
 0x6d5   :  { %v883_v4 = vsel %vm588_vm3, %v881_v3, %v868_v63 }
 0x6d6   :  { %v870_v2 = vpop.permute.xlu1 %869 }
 0x6d7   :  { %v884_v9 = vsel %vm588_vm3, %v882_v6, %v870_v2 }
 0x707   :  { %v876_v5 = vpop.permute.xlu0 %875 }
 0x708   :  { %v886_v8 = vsel %vm885_vm4, %v883_v4, %v876_v5  ;;  %v1222_v4 = vld [vmem:[#allocation8] ss:$0 sm:$0xff] }
 0x709   :  { %v878_v10 = vpop.permute.xlu1 %877  ;;  %v895_v12 = vmul.f32 %v1206_v7, %v886_v8 }
 0x70a   :  { %v887_v11 = vsel %vm885_vm4, %v884_v9, %v878_v10 }
 0x70b   :  { %v896_v13 = vmul.f32 %v1206_v7, %v887_v11 }
 0x70d   :  { %v897_v14 = vpack.c.bf16 %v896_v13, %v895_v12 }
 0x70f   :  { %1303 = vmatmul.mubr.msk.bf16.vlgmr.msra.gmra.mrb[16].mxu1 %vm146_vm0, %v897_v14 }
 0x710   :  { %1322 = vmatprep.mubr.msk.bf16.mxu1 %vm1657_vm1, %v1655_v47  ;;  %1315 = vmatpush3.bf16.msra.mxu1 %v1403_v31 }
 0x711   :  { %1316 = vmatprep.subr.bf16.mxu1 %v1655_v47 }
 0x714   :  { %1317 = vmatpush3.bf16.msra.mxu1 %v1404_v34 }
 0x715   :  { %1318 = vmatprep.subr.bf16.mxu1 %v1655_v47 }
 0x718   :  { %1319 = vmatpush3.bf16.msra.mxu1 %v1405_v36 }
 0x719   :  { %1320 = vmatprep.subr.bf16.mxu1 %v1655_v47 }
 0x71c   :  { %1321 = vmatpush3.bf16.msra.mxu1 %v1406_v43 }
 0x7e2   :  { %v951_v15 = vpop.f32.mrb[16].mxu1 }
 0x7e3   :  { %v2005_v16 = vadd.f32 %v951_v15, %v1846_v0  ;;  %v1304_v17 = vpop.f32.mrb[17].mxu1  ;;  %v1401_v0 = vld [vmem:[#allocation13] sm:$0xff]  }
 0x7e4   :  { %v954_v18 = vpop.f32.mrb[18].mxu1  ;;  %1307 = vmatpush3.bf16.msra.mxu0 %v1401_v0 }
 0x7e5   :  { %v2008_v19 = vadd.f32 %v954_v18, %v1851_v1  ;;  %v1305_v20 = vpop.f32.mrb[19].mxu1  ;;  %v961_v21 = vmul.f32 %v2005_v16, %v2005_v16  ;;  %1308 = vmatprep.subr.bf16.mxu0 %v1655_v47  ;;  %v1214_v1 = vld [vmem:[%s2065_s5] ss:$0 sm:$0xff] }
 0x7e7   :  { %v963_v22 = vsel %vm146_vm0, %v961_v21, 0.0  ;;  %v962_v23 = vmul.f32 %v2008_v19, %v2008_v19 }
 0x7e8   :  { %964 = vadd.xlane.f32.xlu0 %v963_v22  ;;  %1309 = vmatpush3.bf16.msra.mxu0 %v1402_v24 }
 0x7e9   :  { %v966_v37 = vsel %vm146_vm0, %v962_v23, 0.0 }
 0x7ea   :  { %967 = vadd.xlane.f32.xlu1 %v966_v37 }
 0x7fe   :  { %1052 = vrot.lane.b32.xlu0 %v1214_v1, %s1650_s7 }
 0x875   :  { %v965_v25 = vpop.xlane.xlu0 %964 }
 0x876   :  { %v969_v26 = vmul.f32 0.03125, %v965_v25 }
 0x877   :  { %v968_v27 = vpop.xlane.xlu1 %967 }
 0x878   :  { %v971_v28 = vadd.f32 1e-06, %v969_v26  ;;  %v970_v29 = vmul.f32 0.03125, %v968_v27 }
 0x879   :  { %v1053_v44 = vpop.permute.xlu0 %1052 }
 0x87a   :  { %1443 = vrsqrt.f32 %v971_v28  ;;  %v972_v30 = vadd.f32 1e-06, %v970_v29 }
 0x87c   :  { %1445 = vrsqrt.f32 %v972_v30 }
 0x884   :  { %v1444_v32 = vpop.eup %1443 }
 0x885   :  { %v975_v33 = vmul.f32 %v1444_v32, %v2005_v16 }
 0x886   :  { %v1446_v35 = vpop.eup %1445 }
 0x887   :  { %v976_v39 = vmul.f32 %v1446_v35, %v2008_v19  ;;  %v983_v40 = vmul.f32 %v1210_v38, %v975_v33 }
 0x889   :  { %v984_v41 = vmul.f32 %v1210_v38, %v976_v39 }
 0x88b   :  { %v985_v42 = vpack.c.bf16 %v984_v41, %v983_v40 }
 0x88d   :  { %1311 = vmatmul.mubr.msk.bf16.vlgmr.msra.gmra.mrb[20].mxu0 %vm146_vm0, %v985_v42 }
 0x960   :  { %v1039_v45 = vpop.f32.mrb[20].mxu0 }
 0x961   :  { %v1312_v46 = vpop.f32.mrb[21].mxu0  ;;  %v1055_v48 = vmul.f32 %v1053_v44, %v1039_v45  ;;  %v1215_v52 = vmul.f32 -1.442695, %v1039_v45 }
 0x962   :  { %v1042_v49 = vpop.f32.mrb[22].mxu0 }
 0x963   :  { %1073 = vrot.lane.b32.xlu1 %v1055_v48, %s1650_s7  ;;  %v1313_v50 = vpop.f32.mrb[23].mxu0  ;;  %v1056_v51 = vmul.f32 %v1053_v44, %v1042_v49  ;;  %v1216_v53 = vmul.f32 -1.442695, %v1042_v49  ;;  %1447 = vpow2.f32 %v1215_v52 }
 0x965   :  { %1075 = vrot.lane.b32.xlu0 %v1056_v51, %s1650_s7  ;;  %1449 = vpow2.f32 %v1216_v53  ;;  %s1177_s7 = sshll.u32 %s1662_s12, 4  ;;  %s1178_s7 = int_to_ptr.vmem [resolvable:$true] %s1177_s7 }
 0x966   :  { %s1609_s2 = scalar_lea.vmem %s1178_s7, 256  ;;  %p1614_p1 = scmp.lt.s32.totalorder %s1178_s7, %s1178_s7 }
 0x967   :  { %p1610_p0 = scmp.ne.s32.totalorder %s1178_s7, %s1609_s2  ;;  %p1615_p2 = scmp.lt.s32.totalorder %s1609_s2, %s1609_s2 }
 0x969   :  { %p1616_p3 = por %p1615_p2, %p1614_p1 }
 0x96b   :  { %p1617_p4 = pnand %p1616_p3, %p1610_p0 }
 0x96d   :  { %v1448_v47 = vpop.eup %1447 }
 0x96e   :  { %v1063_v55 = vadd.f32 1.0, %v1448_v47 }
 0x96f   :  { %v1450_v54 = vpop.eup %1449 }
 0x970   :  { %v1064_v56 = vadd.f32 1.0, %v1450_v54  ;;  %1451 = vrcp.f32 %v1063_v55 }
 0x972   :  { %1453 = vrcp.f32 %v1064_v56 }
 0x97a   :  { %v1452_v57 = vpop.eup %1451 }
 0x97b   :  { %v1069_v60 = vmul.f32 %v1452_v57, %v1039_v45 }
 0x97c   :  { %v1454_v58 = vpop.eup %1453 }
 0x97d   :  { %v1070_v61 = vmul.f32 %v1454_v58, %v1042_v49 }
 0x9d5   :  { %v1074_v59 = vpop.permute.xlu1 %1073 }
 0x9d6   :  { %v1079_v63 = vmul.f32 %v1074_v59, %v1069_v60 }
 0x9d7   :  { %v1076_v62 = vpop.permute.xlu0 %1075 }
 0x9d8   :  { %v1080_v2 = vmul.f32 %v1076_v62, %v1070_v61 }
 0x9da   :  { %v1081_v3 = vpack.c.bf16 %v1080_v2, %v1079_v63 }
 0x9dc   :  { %1323 = vmatmul.mubr.msk.bf16.vlgmr.msra.gmra.mrb[20].mxu1 %vm1114_vm5, %v1081_v3 }
 0xaaf   :  { %v1152_v5 = vpop.f32.mrb[20].mxu1 }
 0xab0   :  { %v1166_v6 = vmul.f32 %v1222_v4, %v1152_v5  ;;  %v1324_v7 = vpop.f32.mrb[21].mxu1 }
 0xab1   :  { %v1155_v8 = vpop.f32.mrb[22].mxu1 }
 0xab2   :  { %v1168_v9 = vadd.f32 %v1166_v6, %v2005_v16  ;;  %v1167_v10 = vmul.f32 %v1222_v4, %v1155_v8  ;;  %v1325_v11 = vpop.f32.mrb[23].mxu1 }
 0xab4   :  { %1170 = vst.msk [vmem:[#allocation14] sm:$0xff] %vm146_vm0, %v1168_v9  ;;  %v1169_v12 = vadd.f32 %v1167_v10, %v2008_v19 }
 0xab6   :  { %1171 = vst.msk [vmem:[#allocation14 + $0x8] sm:$0xff] %vm146_vm0, %v1169_v12 }
 0xab7   :  { %1620 = shalt.err (!%p1617_p4)
}
 0xab8   :  { %s1621_s18 = scalar_lea.hbm %s2073_s13, 256 }
 0xab9   :  { %p1622_p5 = scmp.ne.s32.totalorder %s2073_s13, %s1621_s18  ;;  %p1625_p6 = scmp.lt.u32.totalorder %s1621_s18, %s2073_s13 }
 0xabb   :  { %p1627_p7 = pnand %p1625_p6, %p1622_p5 }
 0xabd   :  { %1630 = shalt.err (!%p1627_p7)
}
 0xabe   :  { %1183 = dma.vmem_to_hbm [thread:$0]  %s1178_s7, 256, %s2073_s13, [#allocation4], %s1643_s20, %s1643_s20, %s1644_s21  }
 0xabf   :  { %1639 = dma.done.wait [#allocation4], 256  }
 0xac0   :  { %1640 = vsyncadd [#allocation4], 4294967040 }
 0xac1   :  { %1187 = vsyncpa [#allocation3], 1 }
 0xac2   :  { %1188 = vsyncpa [#allocation6], 1 }
 0xac3   :  { %1189 = vsyncpa [#allocation9], 1 }
 0xac4   :  { %1190 = vsyncpa [#allocation12], 1 }
 0xac5   :  { %1191 = vsyncpa [#allocation4], 1 }

</bundles_post_ra>
